<compile_context>
chip_gen: v7x
topology: tpu7x:2x2x1
jax: 0.10.0
libtpu: 0.0.40
codegen_flags: <defaults>
</compile_context>

<pallas_src>
import functools

import jax
import jax.numpy as jnp
from jax.experimental import pallas as pl
from jax.experimental.pallas import tpu as pltpu

HID = 64          # hidden width of fc1/fc2/fc3
LANE = 128        # TPU vreg lane width
MAX_TB = 8192     # cap on batch-tile columns (VMEM-safe on v5e/v6e/v7x)


def actor_kernel(x_ref, p1_ref, w2_ref, w3_ref, w4_ref, b23_ref, b4_ref, out_ref):
    """One batch tile. Activations are feature-major: (features, batch_tile)."""
    tb = x_ref.shape[1]
    x = x_ref[...]                                               # (1, TB) f32

    # Augmented input [x ; 1 ; 0 x6] so fc1 (+ its bias) is a single K=8 MXU matmul.
    row = jax.lax.broadcasted_iota(jnp.int32, (8, tb), 0)
    xa = jnp.where(row == 0, jnp.broadcast_to(x, (8, tb)),
                   (row == 1).astype(jnp.float32))               # (8, TB) f32

    # fc1: (64, 8) @ (8, TB) on the MXU (bias folded into column 1), relu, then cast
    # so fc2 gets single-pass bf16 MXU inputs (accumulation stays f32).
    h = jnp.dot(p1_ref[...], xa, preferred_element_type=jnp.float32)   # (64, TB) f32
    h = jnp.maximum(h, 0.0).astype(jnp.bfloat16)

    # fc2 / fc3: 64x64 bf16 matmuls, f32 accumulate; bias + relu on the VPU in f32.
    h = jnp.dot(w2_ref[...], h, preferred_element_type=jnp.float32) + b23_ref[:, 0:1]
    h = jnp.maximum(h, 0.0).astype(jnp.bfloat16)
    h = jnp.dot(w3_ref[...], h, preferred_element_type=jnp.float32) + b23_ref[:, 1:2]
    h = jnp.maximum(h, 0.0).astype(jnp.bfloat16)

    # action head: (8, 64) @ (64, TB); only row 0 is real (rows 1..7 of w4 are zero).
    a = jnp.dot(w4_ref[...], h, preferred_element_type=jnp.float32)    # (8, TB) f32
    out_ref[...] = jnp.tanh(a[0:1, :] + b4_ref[0])               # lane-dense (1, TB) store


@functools.partial(jax.jit, static_argnames=("tb",))
def actor_forward(x, params, *, tb=MAX_TB):
    """x: (batch, 1) float32 -> (batch, 1) float32.  params in PyTorch layouts."""
    (w1, b1), (w2, b2), (w3, b3), (w4, b4) = params
    batch = x.shape[0]

    # ---- batch tiling (columns of the feature-major layout) ----------------------
    tb = max(LANE, (min(int(tb), MAX_TB) // LANE) * LANE)
    one_block = pl.cdiv(batch, LANE) * LANE            # smallest single-tile cover
    if one_block <= tb:
        if one_block >= 8 * LANE:                      # enough work: use >=2 steps so
            tb = pl.cdiv(one_block, 2 * LANE) * LANE   # both v7x TensorCores get a share
        else:
            tb = one_block
    padded = pl.cdiv(batch, tb) * tb
    grid = (padded // tb,)

    # ---- pack parameters into kernel layout (tiny; fused away under jit) ---------
    f32, bf16 = jnp.float32, jnp.bfloat16
    p1 = jnp.concatenate([w1.astype(f32), b1.reshape(HID, 1).astype(f32),
                          jnp.zeros((HID, 6), f32)], axis=1)             # (64, 8)
    w2b = w2.astype(bf16)                                                # (64, 64)
    w3b = w3.astype(bf16)                                                # (64, 64)
    w4b = jnp.concatenate([w4.astype(bf16),
                           jnp.zeros((7, HID), bf16)], axis=0)           # (8, 64)
    b23 = jnp.stack([b2, b3], axis=1).astype(f32)                        # (64, 2)
    b4v = b4.reshape(1).astype(f32)                                      # (1,) -> SMEM

    # ---- feature-major input; pad only when the batch is not tile-aligned --------
    xt = x.astype(f32).reshape(1, batch)
    if padded != batch:
        xt = jnp.pad(xt, ((0, 0), (0, padded - batch)))

    const = lambda i: (0, 0)   # weights/biases stay VMEM-resident across grid steps

    out_t = pl.pallas_call(
        actor_kernel,
        out_shape=jax.ShapeDtypeStruct((1, padded), jnp.float32),
        grid_spec=pltpu.PrefetchScalarGridSpec(
            num_scalar_prefetch=0,
            grid=grid,
            in_specs=[
                pl.BlockSpec((1, tb), lambda i: (0, i)),                 # x (feature-major)
                pl.BlockSpec((HID, 8), const),                           # [w1 | b1 | 0]
                pl.BlockSpec((HID, HID), const),                         # w2 (bf16)
                pl.BlockSpec((HID, HID), const),                         # w3 (bf16)
                pl.BlockSpec((8, HID), const),                           # w4 zero-padded (bf16)
                pl.BlockSpec((HID, 2), const),                           # [b2 | b3]
                pl.BlockSpec(memory_space=pltpu.MemorySpace.SMEM),       # b4 scalar
            ],
            out_specs=pl.BlockSpec((1, tb), lambda i: (0, i)),
        ),
        compiler_params=pltpu.CompilerParams(
            dimension_semantics=("parallel",),
            vmem_limit_bytes=32 * 1024 * 1024,
        ),
    )(xt, p1, w2b, w3b, w4b, b23, b4v)

    out = out_t[0]
    if padded != batch:
        out = out[:batch]
    return out.reshape(batch, 1)


def init_params(key):
    """PyTorch nn.Linear default init U(-1/sqrt(fan_in), +1/sqrt(fan_in)), PyTorch layouts."""
    def layer(k, fan_in, fan_out):
        kw, kb = jax.random.split(k)
        bound = 1.0 / float(fan_in) ** 0.5
        w = jax.random.uniform(kw, (fan_out, fan_in), jnp.float32, -bound, bound)
        b = jax.random.uniform(kb, (fan_out,), jnp.float32, -bound, bound)
        return w, b

    k1, k2, k3, k4 = jax.random.split(key, 4)
    return (layer(k1, 1, HID), layer(k2, HID, HID),
            layer(k3, HID, HID), layer(k4, HID, 1))


def reference_forward(x, params):
    """Pure-JAX f32 reference matching the PyTorch module exactly."""
    (w1, b1), (w2, b2), (w3, b3), (w4, b4) = params
    h = jnp.maximum(x @ w1.T + b1, 0.0)
    h = jnp.maximum(h @ w2.T + b2, 0.0)
    h = jnp.maximum(h @ w3.T + b3, 0.0)
    return jnp.tanh(h @ w4.T + b4)


def reference_forward_bf16(x, params):
    """Reference mirroring the kernel's precision policy: f32 fc1, bf16 inputs to the
    fc2/fc3/head matmuls with f32 accumulation, f32 bias/relu/tanh."""
    (w1, b1), (w2, b2), (w3, b3), (w4, b4) = params
    bf = jnp.bfloat16
    h = jnp.maximum(x @ w1.T + b1, 0.0).astype(bf)
    h = jnp.dot(h, w2.astype(bf).T, preferred_element_type=jnp.float32) + b2
    h = jnp.maximum(h, 0.0).astype(bf)
    h = jnp.dot(h, w3.astype(bf).T, preferred_element_type=jnp.float32) + b3
    h = jnp.maximum(h, 0.0).astype(bf)
    return jnp.tanh(jnp.dot(h, w4.astype(bf).T, preferred_element_type=jnp.float32) + b4)


if __name__ == "__main__":
    key = jax.random.PRNGKey(0)
    k_par, k_small, k_mid, k_big = jax.random.split(key, 4)
    params = init_params(k_par)

    # Small batch (the Actor takes (batch, 1) state inputs): single-block path.
    x = jax.random.normal(k_small, (8, 1), jnp.float32)
    out = jax.block_until_ready(actor_forward(x, params))
    assert out.shape == (8, 1)
    assert jnp.allclose(out, reference_forward_bf16(x, params), atol=5e-3, rtol=0)
    # Loose sanity bound vs the exact f32 module (bf16 matmuls => ~1e-2 level error).
    assert jnp.allclose(out, reference_forward(x, params), atol=1e-1, rtol=0)

    # Non-aligned batch: multi-step grid + tail-padding path.
    xm = jax.random.normal(k_mid, (1000, 1), jnp.float32)
    om = jax.block_until_ready(actor_forward(xm, params))
    assert om.shape == (1000, 1)
    assert jnp.allclose(om, reference_forward_bf16(xm, params), atol=5e-3, rtol=0)

    # Lane-aligned batch: no-pad fast path with a 2-step ("parallel") grid.
    xb = jax.random.normal(k_big, (4096, 1), jnp.float32)
    ob = jax.block_until_ready(actor_forward(xb, params))
    assert ob.shape == (4096, 1)
    assert jnp.allclose(ob, reference_forward_bf16(xb, params), atol=5e-3, rtol=0)

    print("KERNEL_OK")
</pallas_src>

<mosaic_0001>
module attributes {stable_mosaic.version = 11 : i64} {
  func.func @actor_kernel(%arg0: i32, %arg1: memref<1x128xf32, #tpu.memory_space<vmem>>, %arg2: memref<64x8xf32, #tpu.memory_space<vmem>>, %arg3: memref<64x64xbf16, #tpu.memory_space<vmem>>, %arg4: memref<64x64xbf16, #tpu.memory_space<vmem>>, %arg5: memref<8x64xbf16, #tpu.memory_space<vmem>>, %arg6: memref<64x2xf32, #tpu.memory_space<vmem>>, %arg7: memref<1xf32, #tpu.memory_space<smem>>, %arg8: memref<1x128xf32, #tpu.memory_space<vmem>>) attributes {dimension_semantics = [#tpu.dimension_semantics<parallel>], iteration_bounds = array<i64: 1>, scalar_prefetch = 0 : i64, scratch_operands = 0 : i64, tpu.core_type = #tpu.core_type<tc>, window_params = [{transform_indices = @transform_0, window_bounds = array<i64: 1, 128>}, {pipeline_mode = #tpu.pipeline_mode<synchronous>, transform_indices = @transform_1, window_bounds = array<i64: 64, 8>}, {pipeline_mode = #tpu.pipeline_mode<synchronous>, transform_indices = @transform_2, window_bounds = array<i64: 64, 64>}, {pipeline_mode = #tpu.pipeline_mode<synchronous>, transform_indices = @transform_3, window_bounds = array<i64: 64, 64>}, {pipeline_mode = #tpu.pipeline_mode<synchronous>, transform_indices = @transform_4, window_bounds = array<i64: 8, 64>}, {pipeline_mode = #tpu.pipeline_mode<synchronous>, transform_indices = @transform_5, window_bounds = array<i64: 64, 2>}, {transform_indices = @transform_6, window_bounds = array<i64: 1>}, {transform_indices = @transform_7, window_bounds = array<i64: 1, 128>}]} {
    %c0 = arith.constant 0 : index
    %c0_0 = arith.constant 0 : index
    %0 = vector.load %arg1[%c0, %c0_0] : memref<1x128xf32, #tpu.memory_space<vmem>>, vector<1x128xf32>
    %1 = tpu.iota {dimensions = array<i32: 0>} : vector<8x128xi32>
    %c0_i32 = arith.constant 0 : i32
    %2 = vector.broadcast %c0_i32 : i32 to vector<8x128xi32>
    %3 = arith.cmpi eq, %1, %2 : vector<8x128xi32>
    %4 = vector.shape_cast %0 : vector<1x128xf32> to vector<1x128xf32>
    %5 = vector.broadcast %4 : vector<1x128xf32> to vector<8x128xf32>
    %c1_i32 = arith.constant 1 : i32
    %6 = vector.broadcast %c1_i32 : i32 to vector<8x128xi32>
    %7 = arith.cmpi eq, %1, %6 : vector<8x128xi32>
    %8 = arith.extui %7 : vector<8x128xi1> to vector<8x128xi32>
    %9 = arith.sitofp %8 : vector<8x128xi32> to vector<8x128xf32>
    %10 = arith.select %3, %5, %9 : vector<8x128xi1>, vector<8x128xf32>
    %c0_1 = arith.constant 0 : index
    %c0_2 = arith.constant 0 : index
    %11 = vector.load %arg2[%c0_1, %c0_2] : memref<64x8xf32, #tpu.memory_space<vmem>>, vector<64x8xf32>
    %cst = arith.constant dense<0.000000e+00> : vector<64x128xf32>
    %12 = tpu.matmul %11, %10, %cst {dimension_numbers = #tpu.dot_dimension_numbers<[1], [0], [0], [1], [0, 0, 1, 1], [], []>} : vector<64x8xf32>, vector<8x128xf32>, vector<64x128xf32> -> vector<64x128xf32>
    %cst_3 = arith.constant 0.000000e+00 : f32
    %13 = vector.broadcast %cst_3 : f32 to vector<64x128xf32>
    %14 = arith.maximumf %12, %13 : vector<64x128xf32>
    %15 = arith.truncf %14 : vector<64x128xf32> to vector<64x128xbf16>
    %c0_4 = arith.constant 0 : index
    %c0_5 = arith.constant 0 : index
    %16 = vector.load %arg3[%c0_4, %c0_5] : memref<64x64xbf16, #tpu.memory_space<vmem>>, vector<64x64xbf16>
    %cst_6 = arith.constant dense<0.000000e+00> : vector<64x128xf32>
    %17 = tpu.matmul %16, %15, %cst_6 {dimension_numbers = #tpu.dot_dimension_numbers<[1], [0], [0], [1], [0, 0, 1, 1], [], []>} : vector<64x64xbf16>, vector<64x128xbf16>, vector<64x128xf32> -> vector<64x128xf32>
    %c0_7 = arith.constant 0 : index
    %c0_8 = arith.constant 0 : index
    %18 = vector.load %arg6[%c0_7, %c0_8] : memref<64x2xf32, #tpu.memory_space<vmem>>, vector<64x1xf32>
    %19 = vector.broadcast %18 : vector<64x1xf32> to vector<64x128xf32>
    %20 = arith.addf %17, %19 : vector<64x128xf32>
    %cst_9 = arith.constant 0.000000e+00 : f32
    %21 = vector.broadcast %cst_9 : f32 to vector<64x128xf32>
    %22 = arith.maximumf %20, %21 : vector<64x128xf32>
    %23 = arith.truncf %22 : vector<64x128xf32> to vector<64x128xbf16>
    %c0_10 = arith.constant 0 : index
    %c0_11 = arith.constant 0 : index
    %24 = vector.load %arg4[%c0_10, %c0_11] : memref<64x64xbf16, #tpu.memory_space<vmem>>, vector<64x64xbf16>
    %cst_12 = arith.constant dense<0.000000e+00> : vector<64x128xf32>
    %25 = tpu.matmul %24, %23, %cst_12 {dimension_numbers = #tpu.dot_dimension_numbers<[1], [0], [0], [1], [0, 0, 1, 1], [], []>} : vector<64x64xbf16>, vector<64x128xbf16>, vector<64x128xf32> -> vector<64x128xf32>
    %c0_13 = arith.constant 0 : index
    %c1 = arith.constant 1 : index
    %26 = vector.load %arg6[%c0_13, %c1] : memref<64x2xf32, #tpu.memory_space<vmem>>, vector<64x1xf32>
    %27 = vector.broadcast %26 : vector<64x1xf32> to vector<64x128xf32>
    %28 = arith.addf %25, %27 : vector<64x128xf32>
    %cst_14 = arith.constant 0.000000e+00 : f32
    %29 = vector.broadcast %cst_14 : f32 to vector<64x128xf32>
    %30 = arith.maximumf %28, %29 : vector<64x128xf32>
    %31 = arith.truncf %30 : vector<64x128xf32> to vector<64x128xbf16>
    %c0_15 = arith.constant 0 : index
    %c0_16 = arith.constant 0 : index
    %32 = vector.load %arg5[%c0_15, %c0_16] : memref<8x64xbf16, #tpu.memory_space<vmem>>, vector<8x64xbf16>
    %cst_17 = arith.constant dense<0.000000e+00> : vector<8x128xf32>
    %33 = tpu.matmul %32, %31, %cst_17 {dimension_numbers = #tpu.dot_dimension_numbers<[1], [0], [0], [1], [0, 0, 1, 1], [], []>} : vector<8x64xbf16>, vector<64x128xbf16>, vector<8x128xf32> -> vector<8x128xf32>
    %34 = vector.extract_strided_slice %33 {offsets = [0, 0], sizes = [1, 128], strides = [1, 1]} : vector<8x128xf32> to vector<1x128xf32>
    %c0_18 = arith.constant 0 : index
    %35 = memref.load %arg7[%c0_18] : memref<1xf32, #tpu.memory_space<smem>>
    %36 = vector.broadcast %35 : f32 to vector<1x128xf32>
    %37 = arith.addf %34, %36 : vector<1x128xf32>
    %38 = math.tanh %37 : vector<1x128xf32>
    %c0_19 = arith.constant 0 : index
    %c0_20 = arith.constant 0 : index
    %39 = vector.load %arg8[%c0_19, %c0_20] : memref<1x128xf32, #tpu.memory_space<vmem>>, vector<1x128xf32>
    tpu.vector_store %arg8[%c0_19, %c0_20], %38 {strides = array<i32>} : memref<1x128xf32, #tpu.memory_space<vmem>>, vector<1x128xf32>,
    return
  }
  func.func @transform_0(%arg0: i32) -> (i32, i32) {
    %c0_i32 = arith.constant 0 : i32
    %c0_i32_0 = arith.constant 0 : i32
    return %c0_i32, %arg0 : i32, i32
  }
  func.func @transform_1(%arg0: i32) -> (i32, i32) {
    %c0_i32 = arith.constant 0 : i32
    %c0_i32_0 = arith.constant 0 : i32
    %c0_i32_1 = arith.constant 0 : i32
    return %c0_i32, %c0_i32_0 : i32, i32
  }
  func.func @transform_2(%arg0: i32) -> (i32, i32) {
    %c0_i32 = arith.constant 0 : i32
    %c0_i32_0 = arith.constant 0 : i32
    %c0_i32_1 = arith.constant 0 : i32
    return %c0_i32, %c0_i32_0 : i32, i32
  }
  func.func @transform_3(%arg0: i32) -> (i32, i32) {
    %c0_i32 = arith.constant 0 : i32
    %c0_i32_0 = arith.constant 0 : i32
    %c0_i32_1 = arith.constant 0 : i32
    return %c0_i32, %c0_i32_0 : i32, i32
  }
  func.func @transform_4(%arg0: i32) -> (i32, i32) {
    %c0_i32 = arith.constant 0 : i32
    %c0_i32_0 = arith.constant 0 : i32
    %c0_i32_1 = arith.constant 0 : i32
    return %c0_i32, %c0_i32_0 : i32, i32
  }
  func.func @transform_5(%arg0: i32) -> (i32, i32) {
    %c0_i32 = arith.constant 0 : i32
    %c0_i32_0 = arith.constant 0 : i32
    %c0_i32_1 = arith.constant 0 : i32
    return %c0_i32, %c0_i32_0 : i32, i32
  }
  func.func @transform_6(%arg0: i32) -> i32 {
    %c0_i32 = arith.constant 0 : i32
    %c0_i32_0 = arith.constant 0 : i32
    return %c0_i32 : i32
  }
  func.func @transform_7(%arg0: i32) -> (i32, i32) {
    %c0_i32 = arith.constant 0 : i32
    %c0_i32_0 = arith.constant 0 : i32
    return %c0_i32, %arg0 : i32, i32
  }
}

</mosaic_0001>

<bundles_post_ra>
// kernel: actor_forward.1
= control target key start
LH: loop header
LB: loop body
LE: loop exit
PB: predicated region body
PF: predicated region fallthrough
CT: control target
= control target key end

     0   :  { %v29_v0 = vlaneseq  ;;  %vm50_vm0 = vcmask 64512   ;;  %v693_v4 = vmov 0.0   ;;  %vm268_vm3 = vcmask 523264   ;;  %s844_s0 = inlined_call_operand.vmem [shape: f32[1,128], index: 0, kind: input, shape index: {}]   ;;  %s845_s1 = inlined_call_operand.vmem [shape: f32[64,8], index: 1, kind: input, shape index: {}]   ;;  %s846_s2 = inlined_call_operand.vmem [shape: bf16[64,64], index: 2, kind: input, shape index: {}]   ;;  %s847_s5 = inlined_call_operand.vmem [shape: f32[64,2], index: 5, kind: input, shape index: {}]   ;;  %s848_s3 = inlined_call_operand.vmem [shape: bf16[64,64], index: 3, kind: input, shape index: {}]   ;;  %s849_s4 = inlined_call_operand.vmem [shape: bf16[8,64], index: 4, kind: input, shape index: {}]   ;;  %s850_s6 = inlined_call_operand.<no memory space> [shape: f32[1], index: 6, kind: input, shape index: {}]   ;;  %s851_s7 = inlined_call_operand.vmem [shape: f32[1,128], index: 7, kind: output, shape index: {}]  }
   0x1   :  { %v42_v1 = vld [vmem:[%s845_s1] sm:$0xff]  ;;  %v43_v7 = vld [vmem:[%s845_s1 + $0x8] sm:$0xff]  ;;  %v44_v8 = vld [vmem:[%s845_s1 + $0x10] sm:$0xff]  ;;  %v694_v15 = vmov 0   ;;  %v695_v48 = vmov 1   ;;  %vm696_vm4 = vmmov 0  }
   0x2   :  { %v30_v2 = vshrl.u32 %v29_v0, 7  ;;  %619 = vmatprep.mubr.msk.f32.mxu0 %vm50_vm0, %v42_v1  ;;  %v560_v3 = vld [vmem:[%s844_s0] ss:$0 sm:$0xff]  ;;  %v45_v9 = vld [vmem:[%s845_s1 + $0x18] sm:$0xff]  ;;  %v47_v11 = vld [vmem:[%s845_s1 + $0x28] sm:$0xff]  ;;  %679 = vset.pattern.permute.xlu0 %v694_v15 }
   0x3   :  { %v46_v10 = vld [vmem:[%s845_s1 + $0x20] sm:$0xff]  ;;  %v48_v12 = vld [vmem:[%s845_s1 + $0x30] sm:$0xff]  ;;  %v49_v13 = vld [vmem:[%s845_s1 + $0x38] sm:$0xff]  ;;  %680 = vset.pattern.permute.xlu1 %v694_v15 }
   0x4   :  { %vm31_vm1 = vcmp.eq.s32.totalorder %v30_v2, 0  ;;  %vm38_vm2 = vcmp.eq.s32.totalorder %v30_v2, 1  ;;  %v683_v14 = vld [vmem:[%s846_s2] sm:$0xff]   ;;  %v202_v17 = vld [vmem:[%s847_s5 + $0x10] sm:$0xff]  ;;  %v201_v18 = vld [vmem:[%s847_s5 + $0x8] sm:$0xff] }
   0x5   :  { %v561_v5 = vsel %vm38_vm2, 1.0, %v693_v4  ;;  %639 = vmatprep.mubr.msk.bf16.mxu1 %vm268_vm3, %v683_v14  ;;  %v200_v16 = vld [vmem:[%s847_s5] sm:$0xff]  ;;  %220 = vperm.xlu1 %680, %v202_v17   ;;  %v203_v19 = vld [vmem:[%s847_s5 + $0x18] sm:$0xff]  ;;  %v205_v21 = vld [vmem:[%s847_s5 + $0x28] sm:$0xff] }
   0x6   :  { %v41_v6 = vsel %vm31_vm1, %v560_v3, %v561_v5  ;;  %210 = vperm.xlu0 %679, %v200_v16   ;;  %v204_v20 = vld [vmem:[%s847_s5 + $0x20] sm:$0xff]  ;;  %v206_v22 = vld [vmem:[%s847_s5 + $0x30] sm:$0xff]  ;;  %v207_v23 = vld [vmem:[%s847_s5 + $0x38] sm:$0xff] }
   0x7   :  { %617 = vmatprep.subr.mxu0 %v41_v6  ;;  %v684_v44 = vld [vmem:[%s846_s2 + $0x8] sm:$0xff]   ;;  %v685_v45 = vld [vmem:[%s846_s2 + $0x10] sm:$0xff]   ;;  %v686_v46 = vld [vmem:[%s846_s2 + $0x18] sm:$0xff]  }
   0x8   :  { %618 = vmatpush3.msra.mxu0 %v41_v6  ;;  %v687_v47 = vld [vmem:[%s848_s3] sm:$0xff]  }
   0x9   :  { %620 = vmatmul.mubr.msk.f32.vlgmr.msra.gmra.mrb[0].mxu0 %vm50_vm0, %v43_v7  ;;  %225 = vperm.xlu1 %680, %v203_v19  }
   0xa   :  { %622 = vmatprep.mubr.msk.f32.mxu0 %vm50_vm0, %v44_v8  ;;  %215 = vperm.xlu0 %679, %v201_v18  }
   0xd   :  { %623 = vmatmul.mubr.msk.f32.gmra.mrb[2].mxu0 %vm50_vm0, %v45_v9  ;;  %235 = vperm.xlu1 %680, %v205_v21  }
   0xe   :  { %625 = vmatprep.mubr.msk.f32.mxu0 %vm50_vm0, %v46_v10  ;;  %230 = vperm.xlu0 %679, %v204_v20  }
  0x11   :  { %626 = vmatmul.mubr.msk.f32.gmra.mrb[4].mxu0 %vm50_vm0, %v47_v11  ;;  %245 = vperm.xlu1 %680, %v207_v23  }
  0x12   :  { %628 = vmatprep.mubr.msk.f32.mxu0 %vm50_vm0, %v48_v12  ;;  %240 = vperm.xlu0 %679, %v206_v22  }
  0x15   :  { %629 = vmatmul.mubr.msk.f32.gmra.mrb[6].mxu0 %vm50_vm0, %v49_v13  ;;  %682 = vset.pattern.permute.xlu1 %v695_v48 }
  0x16   :  { %655 = vmatprep.mubr.msk.bf16.mxu0 %vm268_vm3, %v687_v47  ;;  %681 = vset.pattern.permute.xlu0 %v695_v48 }
  0x17   :  { %371 = vperm.xlu1 %682, %v201_v18   ;;  %367 = vperm.xlu0 %681, %v200_v16  }
  0x1b   :  { %375 = vperm.xlu1 %682, %v202_v17   ;;  %379 = vperm.xlu0 %681, %v203_v19  }
  0x1f   :  { %383 = vperm.xlu1 %682, %v204_v20   ;;  %387 = vperm.xlu0 %681, %v205_v21  }
  0x23   :  { %391 = vperm.xlu1 %682, %v206_v22   ;;  %395 = vperm.xlu0 %681, %v207_v23   ;;  %v688_v22 = vld [vmem:[%s848_s3 + $0x8] sm:$0xff]   ;;  %v689_v23 = vld [vmem:[%s848_s3 + $0x10] sm:$0xff]  }
  0x84   :  { %v221_v50 = vpop.permute.xlu1 %220 }
  0x85   :  { %v211_v49 = vpop.permute.xlu0 %210 }
  0x88   :  { %v226_v52 = vpop.permute.xlu1 %225 }
  0x89   :  { %v216_v51 = vpop.permute.xlu0 %215 }
  0x8c   :  { %v236_v61 = vpop.permute.xlu1 %235 }
  0x8d   :  { %v231_v56 = vpop.permute.xlu0 %230 }
  0x90   :  { %v246_v10 = vpop.permute.xlu1 %245 }
  0x91   :  { %v241_v5 = vpop.permute.xlu0 %240 }
  0xdc   :  { %v621_v24 = vpop.f32.mrb[0].mxu0 }
  0xdd   :  { %v181_v25 = vmax.f32 %v621_v24, 0.0  ;;  %v141_v26 = vpop.f32.mrb[1].mxu0  ;;  %v690_v24 = vld [vmem:[%s848_s3 + $0x18] sm:$0xff]  }
  0xde   :  { %v180_v27 = vmax.f32 %v141_v26, 0.0  ;;  %v368_v26 = vpop.permute.xlu0 %367 }
  0xe0   :  { %v624_v28 = vpop.f32.mrb[2].mxu0  ;;  %v188_v29 = vpack.c.bf16 %v181_v25, %v180_v27  ;;  %v372_v25 = vpop.permute.xlu1 %371 }
  0xe1   :  { %v183_v30 = vmax.f32 %v624_v28, 0.0  ;;  %v151_v31 = vpop.f32.mrb[3].mxu0 }
  0xe2   :  { %v182_v32 = vmax.f32 %v151_v31, 0.0  ;;  %631 = vmatprep.subr.bf16.mxu1 %v188_v29  ;;  %v380_v28 = vpop.permute.xlu0 %379 }
  0xe3   :  { %632 = vmatpush3.bf16.msra.mxu1 %v188_v29 }
  0xe4   :  { %v189_v33 = vpack.c.bf16 %v183_v30, %v182_v32  ;;  %v627_v34 = vpop.f32.mrb[4].mxu0  ;;  %v376_v27 = vpop.permute.xlu1 %375 }
  0xe5   :  { %v185_v35 = vmax.f32 %v627_v34, 0.0  ;;  %v161_v36 = vpop.f32.mrb[5].mxu0 }
  0xe6   :  { %v184_v37 = vmax.f32 %v161_v36, 0.0  ;;  %633 = vmatprep.subr.bf16.mxu1 %v189_v33 }
  0xe7   :  { %634 = vmatpush3.bf16.msra.mxu1 %v189_v33 }
  0xe8   :  { %v190_v38 = vpack.c.bf16 %v185_v35, %v184_v37  ;;  %v630_v39 = vpop.f32.mrb[6].mxu0  ;;  %v384_v32 = vpop.permute.xlu1 %383 }
  0xe9   :  { %v187_v40 = vmax.f32 %v630_v39, 0.0  ;;  %v171_v41 = vpop.f32.mrb[7].mxu0  ;;  %v388_v37 = vpop.permute.xlu0 %387 }
  0xea   :  { %v186_v42 = vmax.f32 %v171_v41, 0.0  ;;  %635 = vmatprep.subr.bf16.mxu1 %v190_v38 }
  0xeb   :  { %636 = vmatpush3.bf16.msra.mxu1 %v190_v38 }
  0xec   :  { %v191_v43 = vpack.c.bf16 %v187_v40, %v186_v42 }
  0xee   :  { %637 = vmatprep.subr.bf16.mxu1 %v191_v43 }
  0xef   :  { %638 = vmatpush3.bf16.msra.mxu1 %v191_v43 }
  0xf0   :  { %663 = vmatprep.subr.bf16.mxu1 %v693_v4 }
  0xf2   :  { %640 = vmatmul.mubr.msk.bf16.vlgmr.msra.gmra.mrb[0].mxu1 %vm268_vm3, %v684_v44  ;;  %v392_v44 = vpop.permute.xlu1 %391 }
  0xf3   :  { %643 = vmatprep.mubr.msk.bf16.mxu1 %vm268_vm3, %v685_v45 }
  0xfa   :  { %644 = vmatmul.mubr.msk.bf16.gmra.mrb[4].mxu1 %vm268_vm3, %v686_v46 }
  0xfb   :  { %671 = vmatprep.mubr.msk.bf16.mxu1 %vm696_vm4, %v693_v4 }
 0x1c5   :  { %v641_v53 = vpop.f32.mrb[0].mxu1 }
 0x1c6   :  { %v324_v54 = vadd.f32 %v641_v53, %v221_v50  ;;  %v315_v55 = vpop.f32.mrb[1].mxu1 }
 0x1c7   :  { %v316_v57 = vadd.f32 %v315_v55, %v211_v49  ;;  %v642_v58 = vpop.f32.mrb[2].mxu1  ;;  %v396_v49 = vpop.permute.xlu0 %395 }
 0x1c8   :  { %v327_v59 = vadd.f32 %v642_v58, %v226_v52  ;;  %v318_v60 = vpop.f32.mrb[3].mxu1  ;;  %v348_v63 = vmax.f32 %v324_v54, 0.0 }
 0x1c9   :  { %v319_v62 = vadd.f32 %v318_v60, %v216_v51  ;;  %v346_v1 = vmax.f32 %v316_v57, 0.0 }
 0x1ca   :  { %v349_v0 = vmax.f32 %v327_v59, 0.0 }
 0x1cb   :  { %v347_v2 = vmax.f32 %v319_v62, 0.0  ;;  %v552_v62 = vstv %s850_s6 }
 0x1cc   :  { %v355_v3 = vpack.c.bf16 %v349_v0, %v348_v63 }
 0x1cd   :  { %v354_v6 = vpack.c.bf16 %v347_v2, %v346_v1  ;;  %v645_v7 = vpop.f32.mrb[4].mxu1 }
 0x1ce   :  { %v340_v8 = vadd.f32 %v645_v7, %v241_v5  ;;  %v331_v9 = vpop.f32.mrb[5].mxu1 }
 0x1cf   :  { %v332_v11 = vadd.f32 %v331_v9, %v231_v56  ;;  %v646_v12 = vpop.f32.mrb[6].mxu1  ;;  %647 = vmatprep.subr.bf16.mxu0 %v354_v6 }
 0x1d0   :  { %v343_v13 = vadd.f32 %v646_v12, %v246_v10  ;;  %v334_v14 = vpop.f32.mrb[7].mxu1  ;;  %648 = vmatpush3.bf16.msra.mxu0 %v354_v6  ;;  %v352_v16 = vmax.f32 %v340_v8, 0.0 }
 0x1d1   :  { %v335_v15 = vadd.f32 %v334_v14, %v236_v61  ;;  %649 = vmatprep.subr.bf16.mxu0 %v355_v3  ;;  %v350_v18 = vmax.f32 %v332_v11, 0.0  ;;  %v507_v61 = vld [vmem:[%s849_s4] sm:$0xf] }
 0x1d2   :  { %v353_v17 = vmax.f32 %v343_v13, 0.0 }
 0x1d3   :  { %v351_v19 = vmax.f32 %v335_v15, 0.0 }
 0x1d4   :  { %v357_v20 = vpack.c.bf16 %v353_v17, %v352_v16  ;;  %650 = vmatpush3.bf16.msra.mxu0 %v355_v3 }
 0x1d5   :  { %v356_v21 = vpack.c.bf16 %v351_v19, %v350_v18 }
 0x1d7   :  { %651 = vmatprep.subr.bf16.mxu0 %v356_v21 }
 0x1d8   :  { %652 = vmatpush3.bf16.msra.mxu0 %v356_v21 }
 0x1d9   :  { %653 = vmatprep.subr.bf16.mxu0 %v357_v20 }
 0x1dc   :  { %654 = vmatpush3.bf16.msra.mxu0 %v357_v20 }
 0x1df   :  { %656 = vmatmul.mubr.msk.bf16.vlgmr.msra.gmra.mrb[8].mxu0 %vm268_vm3, %v688_v22 }
 0x1e0   :  { %659 = vmatprep.mubr.msk.bf16.mxu0 %vm268_vm3, %v689_v23 }
 0x1e7   :  { %660 = vmatmul.mubr.msk.bf16.gmra.mrb[12].mxu0 %vm268_vm3, %v690_v24 }
 0x2b2   :  { %v657_v29 = vpop.f32.mrb[8].mxu0 }
 0x2b3   :  { %v473_v30 = vadd.f32 %v657_v29, %v376_v27  ;;  %v464_v31 = vpop.f32.mrb[9].mxu0 }
 0x2b4   :  { %v465_v33 = vadd.f32 %v464_v31, %v368_v26  ;;  %v658_v34 = vpop.f32.mrb[10].mxu0 }
 0x2b5   :  { %v476_v35 = vadd.f32 %v658_v34, %v380_v28  ;;  %v467_v36 = vpop.f32.mrb[11].mxu0  ;;  %v497_v39 = vmax.f32 %v473_v30, 0.0 }
 0x2b6   :  { %v468_v38 = vadd.f32 %v467_v36, %v372_v25  ;;  %v495_v41 = vmax.f32 %v465_v33, 0.0 }
 0x2b7   :  { %v498_v40 = vmax.f32 %v476_v35, 0.0 }
 0x2b8   :  { %v496_v42 = vmax.f32 %v468_v38, 0.0 }
 0x2b9   :  { %v504_v43 = vpack.c.bf16 %v498_v40, %v497_v39 }
 0x2ba   :  { %v503_v45 = vpack.c.bf16 %v496_v42, %v495_v41  ;;  %v661_v46 = vpop.f32.mrb[12].mxu0 }
 0x2bb   :  { %v489_v47 = vadd.f32 %v661_v46, %v392_v44  ;;  %v480_v48 = vpop.f32.mrb[13].mxu0 }
 0x2bc   :  { %v481_v50 = vadd.f32 %v480_v48, %v384_v32  ;;  %v662_v51 = vpop.f32.mrb[14].mxu0  ;;  %664 = vmatpush3.bf16.msra.mxu1 %v503_v45 }
 0x2bd   :  { %v492_v52 = vadd.f32 %v662_v51, %v396_v49  ;;  %v483_v53 = vpop.f32.mrb[15].mxu0  ;;  %665 = vmatprep.subr.bf16.mxu1 %v693_v4  ;;  %v501_v55 = vmax.f32 %v489_v47, 0.0 }
 0x2be   :  { %v484_v54 = vadd.f32 %v483_v53, %v388_v37  ;;  %v499_v57 = vmax.f32 %v481_v50, 0.0 }
 0x2bf   :  { %v502_v56 = vmax.f32 %v492_v52, 0.0 }
 0x2c0   :  { %v500_v58 = vmax.f32 %v484_v54, 0.0  ;;  %666 = vmatpush3.bf16.msra.mxu1 %v504_v43 }
 0x2c1   :  { %v506_v59 = vpack.c.bf16 %v502_v56, %v501_v55  ;;  %667 = vmatprep.subr.bf16.mxu1 %v693_v4 }
 0x2c2   :  { %v505_v60 = vpack.c.bf16 %v500_v58, %v499_v57 }
 0x2c4   :  { %668 = vmatpush3.bf16.msra.mxu1 %v505_v60 }
 0x2c5   :  { %669 = vmatprep.subr.bf16.mxu1 %v693_v4 }
 0x2c8   :  { %670 = vmatpush3.bf16.msra.mxu1 %v506_v59 }
 0x2cb   :  { %672 = vmatmul.mubr.msk.bf16.vlgmr.msra.gmra.mrb[8].mxu1 %vm268_vm3, %v507_v61 }
 0x39e   :  { %v545_v63 = vpop.f32.mrb[8].mxu1 }
 0x39f   :  { %v553_v0 = vadd.f32 %v552_v62, %v545_v63  ;;  %v673_v1 = vpop.f32.mrb[9].mxu1 }
 0x3a0   :  { %v548_v2 = vpop.f32.mrb[10].mxu1 }
 0x3a1   :  { %691 = vtanh.f32 %v553_v0  ;;  %v674_v3 = vpop.f32.mrb[11].mxu1 }
 0x3ab   :  { %v692_v5 = vpop.eup %691 }
 0x3ac   :  { %555 = vst [vmem:[%s851_s7] sm:$0x1] %v692_v5 }

</bundles_post_ra>
